<compile_context>
chip_gen: v5e
topology: v5e:2x2
jax: 0.10.0
libtpu: 0.0.40
codegen_flags: <defaults>
</compile_context>

<pallas_src>
from itertools import chain, combinations_with_replacement

import numpy as np
import jax
import jax.numpy as jnp
from jax.experimental import pallas as pl
from jax.experimental.pallas import tpu as pltpu

_CHUNK_COLS = 1024                 # 8 sublanes x 128 lanes per in-kernel slab
_VMEM_BUDGET = 32 * 1024 * 1024    # budget for double-buffered in+out blocks


def _all_combos(dim: int, degree: int, include_bias: bool = True):
    start = 0 if include_bias else 1
    return [
        tuple(c)
        for c in chain.from_iterable(
            combinations_with_replacement(range(dim), i)
            for i in range(start, degree + 1)
        )
    ]


def _round_up(a: int, m: int) -> int:
    return ((a + m - 1) // m) * m


def _make_poly_kernel(combos, n_chunks: int):
    """Monomial-library kernel for one lane tile.

    x_ref: (dim, S, 128)  -- column n of the flattened batch lives at (:, n//128, n%128)
    o_ref: (F,   S, 128)  -- feature f of column n at (f, n//128, n%128)

    Work proceeds in 8-sublane slabs so every load and every per-feature store
    is a whole (8,128) vreg (dense, unmasked) and the live set stays tiny.
    """

    def kernel(x_ref, o_ref):
        ones = jnp.ones((8, 128), dtype=o_ref.dtype)
        for j in range(n_chunks):
            s0 = j * 8
            x = x_ref[:, s0:s0 + 8, :]                       # (dim, 8, 128)
            cache = {}

            def prod(c):
                # product over a sorted non-empty combo, reusing shared prefixes
                if c in cache:
                    return cache[c]
                r = x[c[0]] if len(c) == 1 else prod(c[:-1]) * x[c[-1]]
                cache[c] = r
                return r

            for f, c in enumerate(combos):
                val = ones if len(c) == 0 else prod(c).astype(o_ref.dtype)
                o_ref[f, s0:s0 + 8, :] = val                 # dense (8,128) store

    return kernel


def sparse_polynomial_features(
    x: jax.Array,
    degree: int,
    include_bias: bool = True,
    sparse_index=None,
    tile_n: int = 8192,
    feature_major: bool = False,
) -> jax.Array:
    """JAX/Pallas equivalent of SparsePolynomialFeatures.forward.

    x: (..., dim) -> (..., F)  (or (F, ...) when feature_major=True).
    sparse_index: optional static list of feature indices (update_basis path).
    """
    dim = x.shape[-1]
    combos = _all_combos(dim, degree, include_bias)
    if sparse_index is not None:
        combos = [combos[int(i)] for i in sparse_index]
    F = len(combos)

    lead = x.shape[:-1]
    N = int(np.prod(lead)) if lead else 1
    itemsize = jnp.dtype(x.dtype).itemsize

    # ---- lane-tile sizing ---------------------------------------------------
    bytes_per_col = 2 * (dim + F) * itemsize          # double-buffered in + out
    cap = max(_CHUNK_COLS,
              (_VMEM_BUDGET // bytes_per_col) // _CHUNK_COLS * _CHUNK_COLS)
    tn = max(_CHUNK_COLS, (int(tile_n) // _CHUNK_COLS) * _CHUNK_COLS)
    tn = min(tn, cap)
    n_cols = _round_up(N, _CHUNK_COLS)
    if n_cols <= tn:
        # A single tile would cover everything; split it in two (when there is
        # enough work) so ("parallel",) can shard across v7x's 2 TensorCores.
        tn = n_cols if n_cols < 2 * _CHUNK_COLS else _round_up(n_cols // 2, _CHUNK_COLS)
    Np = _round_up(n_cols, tn)
    grid = (Np // tn,)
    s_tile = tn // 128
    n_chunks = tn // _CHUNK_COLS

    vmem_limit = int(min(48 * 1024 * 1024,
                         max(4 * bytes_per_col * tn, 16 * 1024 * 1024)))

    # ---- layout prep ----------------------------------------------------------
    # TODO(synk): if the caller can supply x feature-major and consume the
    # (F, ...) output (feature_major=True), both transposes around the
    # bandwidth-bound kernel disappear (fold into the downstream GLM matmul).
    xT = x.reshape(N, dim).T                          # (dim, N)
    if Np != N:
        xT = jnp.pad(xT, ((0, 0), (0, Np - N)))
    x3 = xT.reshape(dim, Np // 128, 128)              # column n -> (:, n//128, n%128)

    out3 = pl.pallas_call(
        _make_poly_kernel(combos, n_chunks),
        out_shape=jax.ShapeDtypeStruct((F, Np // 128, 128), x.dtype),
        grid=grid,
        in_specs=[pl.BlockSpec((dim, s_tile, 128), lambda i: (0, i, 0))],
        out_specs=pl.BlockSpec((F, s_tile, 128), lambda i: (0, i, 0)),
        compiler_params=pltpu.CompilerParams(
            dimension_semantics=("parallel",),
            vmem_limit_bytes=vmem_limit,
        ),
    )(x3)

    out_fm = out3.reshape(F, Np)[:, :N]               # (F, N) feature-major
    if feature_major:
        return out_fm.reshape(F, *lead)
    return out_fm.T.reshape(*lead, F)


def _reference(x: jax.Array, degree: int, include_bias: bool = True) -> jax.Array:
    """Pure-JAX reference identical to the PyTorch Polynomial-list semantics."""
    feats = []
    for c in _all_combos(x.shape[-1], degree, include_bias):
        if len(c) == 0:
            feats.append(jnp.ones(x.shape[:-1], dtype=x.dtype))
        else:
            f = x[..., c[0]]
            for d in c[1:]:
                f = f * x[..., d]
            feats.append(f)
    return jnp.stack(feats, axis=-1)


if __name__ == "__main__":
    key = jax.random.PRNGKey(0)
    k1, k2, k3 = jax.random.split(key, 3)

    # Case 1: dim=4, degree=2 (F=15), N=4096 rows -> two 2048-column tiles
    #         (exercises the >=2-grid-step split for v7x megacore).
    dim, degree = 4, 2
    x1 = jax.random.normal(k1, (16, 256, dim), dtype=jnp.float32)
    out1 = jax.block_until_ready(sparse_polynomial_features(x1, degree))
    ref1 = _reference(x1, degree)
    assert out1.shape == ref1.shape, (out1.shape, ref1.shape)
    np.testing.assert_allclose(np.asarray(out1), np.asarray(ref1), rtol=1e-5, atol=1e-5)

    # Case 2: ragged row count (N = 70 -> padded to a single 1024-column tile).
    x2 = jax.random.normal(k2, (2, 5, 7, dim), dtype=jnp.float32)
    out2 = jax.block_until_ready(sparse_polynomial_features(x2, degree))
    ref2 = _reference(x2, degree)
    assert out2.shape == ref2.shape, (out2.shape, ref2.shape)
    np.testing.assert_allclose(np.asarray(out2), np.asarray(ref2), rtol=1e-5, atol=1e-5)

    # Case 3: non-trivial sparse_index (the update_basis path).
    idx = [0, 2, 5, 9, 14]
    out3 = jax.block_until_ready(sparse_polynomial_features(x2, degree, sparse_index=idx))
    ref3 = ref2[..., jnp.asarray(idx)]
    np.testing.assert_allclose(np.asarray(out3), np.asarray(ref3), rtol=1e-5, atol=1e-5)

    # Case 4: degree=3 (prefix-reuse path) + explicit small tile -> 4-step grid.
    x4 = jax.random.normal(k3, (8, 512, 3), dtype=jnp.float32)
    out4 = jax.block_until_ready(sparse_polynomial_features(x4, 3, tile_n=1024))
    ref4 = _reference(x4, 3)
    np.testing.assert_allclose(np.asarray(out4), np.asarray(ref4), rtol=1e-5, atol=1e-5)

    # Case 5: feature-major output path (output transpose folded into caller).
    out5 = jax.block_until_ready(
        sparse_polynomial_features(x1, degree, feature_major=True))
    np.testing.assert_allclose(np.asarray(jnp.moveaxis(out5, 0, -1)),
                               np.asarray(ref1), rtol=1e-5, atol=1e-5)

    print("KERNEL_OK")
</pallas_src>

<mosaic_0001>
module attributes {stable_mosaic.version = 11 : i64} {
  func.func @kernel(%arg0: i32, %arg1: memref<4x16x128xf32, #tpu.memory_space<vmem>>, %arg2: memref<15x16x128xf32, #tpu.memory_space<vmem>>) attributes {dimension_semantics = [#tpu.dimension_semantics<parallel>], iteration_bounds = array<i64: 2>, scalar_prefetch = 0 : i64, scratch_operands = 0 : i64, tpu.core_type = #tpu.core_type<tc>, window_params = [{transform_indices = @transform_0, window_bounds = array<i64: 4, 16, 128>}, {transform_indices = @transform_1, window_bounds = array<i64: 15, 16, 128>}]} {
    %cst = arith.constant 1.000000e+00 : f32
    %0 = vector.broadcast %cst : f32 to vector<8x128xf32>
    %c0 = arith.constant 0 : index
    %c0_0 = arith.constant 0 : index
    %c0_1 = arith.constant 0 : index
    %1 = vector.load %arg1[%c0, %c0_0, %c0_1] : memref<4x16x128xf32, #tpu.memory_space<vmem>>, vector<4x8x128xf32>
    %c0_2 = arith.constant 0 : index
    %c0_3 = arith.constant 0 : index
    %c0_4 = arith.constant 0 : index
    %2 = vector.load %arg2[%c0_2, %c0_3, %c0_4] : memref<15x16x128xf32, #tpu.memory_space<vmem>>, vector<1x8x128xf32>
    %3 = vector.shape_cast %2 : vector<1x8x128xf32> to vector<8x128xf32>
    %4 = vector.shape_cast %0 : vector<8x128xf32> to vector<1x8x128xf32>
    tpu.vector_store %arg2[%c0_2, %c0_3, %c0_4], %4 {strides = array<i32>} : memref<15x16x128xf32, #tpu.memory_space<vmem>>, vector<1x8x128xf32>,
    %5 = vector.extract_strided_slice %1 {offsets = [0, 0, 0], sizes = [1, 8, 128], strides = [1, 1, 1]} : vector<4x8x128xf32> to vector<1x8x128xf32>
    %6 = vector.shape_cast %5 : vector<1x8x128xf32> to vector<8x128xf32>
    %c1 = arith.constant 1 : index
    %c0_5 = arith.constant 0 : index
    %c0_6 = arith.constant 0 : index
    %7 = vector.load %arg2[%c1, %c0_5, %c0_6] : memref<15x16x128xf32, #tpu.memory_space<vmem>>, vector<1x8x128xf32>
    %8 = vector.shape_cast %7 : vector<1x8x128xf32> to vector<8x128xf32>
    %9 = vector.shape_cast %6 : vector<8x128xf32> to vector<1x8x128xf32>
    tpu.vector_store %arg2[%c1, %c0_5, %c0_6], %9 {strides = array<i32>} : memref<15x16x128xf32, #tpu.memory_space<vmem>>, vector<1x8x128xf32>,
    %10 = vector.extract_strided_slice %1 {offsets = [1, 0, 0], sizes = [1, 8, 128], strides = [1, 1, 1]} : vector<4x8x128xf32> to vector<1x8x128xf32>
    %11 = vector.shape_cast %10 : vector<1x8x128xf32> to vector<8x128xf32>
    %c2 = arith.constant 2 : index
    %c0_7 = arith.constant 0 : index
    %c0_8 = arith.constant 0 : index
    %12 = vector.load %arg2[%c2, %c0_7, %c0_8] : memref<15x16x128xf32, #tpu.memory_space<vmem>>, vector<1x8x128xf32>
    %13 = vector.shape_cast %12 : vector<1x8x128xf32> to vector<8x128xf32>
    %14 = vector.shape_cast %11 : vector<8x128xf32> to vector<1x8x128xf32>
    tpu.vector_store %arg2[%c2, %c0_7, %c0_8], %14 {strides = array<i32>} : memref<15x16x128xf32, #tpu.memory_space<vmem>>, vector<1x8x128xf32>,
    %15 = vector.extract_strided_slice %1 {offsets = [2, 0, 0], sizes = [1, 8, 128], strides = [1, 1, 1]} : vector<4x8x128xf32> to vector<1x8x128xf32>
    %16 = vector.shape_cast %15 : vector<1x8x128xf32> to vector<8x128xf32>
    %c3 = arith.constant 3 : index
    %c0_9 = arith.constant 0 : index
    %c0_10 = arith.constant 0 : index
    %17 = vector.load %arg2[%c3, %c0_9, %c0_10] : memref<15x16x128xf32, #tpu.memory_space<vmem>>, vector<1x8x128xf32>
    %18 = vector.shape_cast %17 : vector<1x8x128xf32> to vector<8x128xf32>
    %19 = vector.shape_cast %16 : vector<8x128xf32> to vector<1x8x128xf32>
    tpu.vector_store %arg2[%c3, %c0_9, %c0_10], %19 {strides = array<i32>} : memref<15x16x128xf32, #tpu.memory_space<vmem>>, vector<1x8x128xf32>,
    %20 = vector.extract_strided_slice %1 {offsets = [3, 0, 0], sizes = [1, 8, 128], strides = [1, 1, 1]} : vector<4x8x128xf32> to vector<1x8x128xf32>
    %21 = vector.shape_cast %20 : vector<1x8x128xf32> to vector<8x128xf32>
    %c4 = arith.constant 4 : index
    %c0_11 = arith.constant 0 : index
    %c0_12 = arith.constant 0 : index
    %22 = vector.load %arg2[%c4, %c0_11, %c0_12] : memref<15x16x128xf32, #tpu.memory_space<vmem>>, vector<1x8x128xf32>
    %23 = vector.shape_cast %22 : vector<1x8x128xf32> to vector<8x128xf32>
    %24 = vector.shape_cast %21 : vector<8x128xf32> to vector<1x8x128xf32>
    tpu.vector_store %arg2[%c4, %c0_11, %c0_12], %24 {strides = array<i32>} : memref<15x16x128xf32, #tpu.memory_space<vmem>>, vector<1x8x128xf32>,
    %25 = vector.extract_strided_slice %1 {offsets = [0, 0, 0], sizes = [1, 8, 128], strides = [1, 1, 1]} : vector<4x8x128xf32> to vector<1x8x128xf32>
    %26 = vector.shape_cast %25 : vector<1x8x128xf32> to vector<8x128xf32>
    %27 = arith.mulf %6, %26 : vector<8x128xf32>
    %c5 = arith.constant 5 : index
    %c0_13 = arith.constant 0 : index
    %c0_14 = arith.constant 0 : index
    %28 = vector.load %arg2[%c5, %c0_13, %c0_14] : memref<15x16x128xf32, #tpu.memory_space<vmem>>, vector<1x8x128xf32>
    %29 = vector.shape_cast %28 : vector<1x8x128xf32> to vector<8x128xf32>
    %30 = vector.shape_cast %27 : vector<8x128xf32> to vector<1x8x128xf32>
    tpu.vector_store %arg2[%c5, %c0_13, %c0_14], %30 {strides = array<i32>} : memref<15x16x128xf32, #tpu.memory_space<vmem>>, vector<1x8x128xf32>,
    %31 = vector.extract_strided_slice %1 {offsets = [1, 0, 0], sizes = [1, 8, 128], strides = [1, 1, 1]} : vector<4x8x128xf32> to vector<1x8x128xf32>
    %32 = vector.shape_cast %31 : vector<1x8x128xf32> to vector<8x128xf32>
    %33 = arith.mulf %6, %32 : vector<8x128xf32>
    %c6 = arith.constant 6 : index
    %c0_15 = arith.constant 0 : index
    %c0_16 = arith.constant 0 : index
    %34 = vector.load %arg2[%c6, %c0_15, %c0_16] : memref<15x16x128xf32, #tpu.memory_space<vmem>>, vector<1x8x128xf32>
    %35 = vector.shape_cast %34 : vector<1x8x128xf32> to vector<8x128xf32>
    %36 = vector.shape_cast %33 : vector<8x128xf32> to vector<1x8x128xf32>
    tpu.vector_store %arg2[%c6, %c0_15, %c0_16], %36 {strides = array<i32>} : memref<15x16x128xf32, #tpu.memory_space<vmem>>, vector<1x8x128xf32>,
    %37 = vector.extract_strided_slice %1 {offsets = [2, 0, 0], sizes = [1, 8, 128], strides = [1, 1, 1]} : vector<4x8x128xf32> to vector<1x8x128xf32>
    %38 = vector.shape_cast %37 : vector<1x8x128xf32> to vector<8x128xf32>
    %39 = arith.mulf %6, %38 : vector<8x128xf32>
    %c7 = arith.constant 7 : index
    %c0_17 = arith.constant 0 : index
    %c0_18 = arith.constant 0 : index
    %40 = vector.load %arg2[%c7, %c0_17, %c0_18] : memref<15x16x128xf32, #tpu.memory_space<vmem>>, vector<1x8x128xf32>
    %41 = vector.shape_cast %40 : vector<1x8x128xf32> to vector<8x128xf32>
    %42 = vector.shape_cast %39 : vector<8x128xf32> to vector<1x8x128xf32>
    tpu.vector_store %arg2[%c7, %c0_17, %c0_18], %42 {strides = array<i32>} : memref<15x16x128xf32, #tpu.memory_space<vmem>>, vector<1x8x128xf32>,
    %43 = vector.extract_strided_slice %1 {offsets = [3, 0, 0], sizes = [1, 8, 128], strides = [1, 1, 1]} : vector<4x8x128xf32> to vector<1x8x128xf32>
    %44 = vector.shape_cast %43 : vector<1x8x128xf32> to vector<8x128xf32>
    %45 = arith.mulf %6, %44 : vector<8x128xf32>
    %c8 = arith.constant 8 : index
    %c0_19 = arith.constant 0 : index
    %c0_20 = arith.constant 0 : index
    %46 = vector.load %arg2[%c8, %c0_19, %c0_20] : memref<15x16x128xf32, #tpu.memory_space<vmem>>, vector<1x8x128xf32>
    %47 = vector.shape_cast %46 : vector<1x8x128xf32> to vector<8x128xf32>
    %48 = vector.shape_cast %45 : vector<8x128xf32> to vector<1x8x128xf32>
    tpu.vector_store %arg2[%c8, %c0_19, %c0_20], %48 {strides = array<i32>} : memref<15x16x128xf32, #tpu.memory_space<vmem>>, vector<1x8x128xf32>,
    %49 = vector.extract_strided_slice %1 {offsets = [1, 0, 0], sizes = [1, 8, 128], strides = [1, 1, 1]} : vector<4x8x128xf32> to vector<1x8x128xf32>
    %50 = vector.shape_cast %49 : vector<1x8x128xf32> to vector<8x128xf32>
    %51 = arith.mulf %11, %50 : vector<8x128xf32>
    %c9 = arith.constant 9 : index
    %c0_21 = arith.constant 0 : index
    %c0_22 = arith.constant 0 : index
    %52 = vector.load %arg2[%c9, %c0_21, %c0_22] : memref<15x16x128xf32, #tpu.memory_space<vmem>>, vector<1x8x128xf32>
    %53 = vector.shape_cast %52 : vector<1x8x128xf32> to vector<8x128xf32>
    %54 = vector.shape_cast %51 : vector<8x128xf32> to vector<1x8x128xf32>
    tpu.vector_store %arg2[%c9, %c0_21, %c0_22], %54 {strides = array<i32>} : memref<15x16x128xf32, #tpu.memory_space<vmem>>, vector<1x8x128xf32>,
    %55 = vector.extract_strided_slice %1 {offsets = [2, 0, 0], sizes = [1, 8, 128], strides = [1, 1, 1]} : vector<4x8x128xf32> to vector<1x8x128xf32>
    %56 = vector.shape_cast %55 : vector<1x8x128xf32> to vector<8x128xf32>
    %57 = arith.mulf %11, %56 : vector<8x128xf32>
    %c10 = arith.constant 10 : index
    %c0_23 = arith.constant 0 : index
    %c0_24 = arith.constant 0 : index
    %58 = vector.load %arg2[%c10, %c0_23, %c0_24] : memref<15x16x128xf32, #tpu.memory_space<vmem>>, vector<1x8x128xf32>
    %59 = vector.shape_cast %58 : vector<1x8x128xf32> to vector<8x128xf32>
    %60 = vector.shape_cast %57 : vector<8x128xf32> to vector<1x8x128xf32>
    tpu.vector_store %arg2[%c10, %c0_23, %c0_24], %60 {strides = array<i32>} : memref<15x16x128xf32, #tpu.memory_space<vmem>>, vector<1x8x128xf32>,
    %61 = vector.extract_strided_slice %1 {offsets = [3, 0, 0], sizes = [1, 8, 128], strides = [1, 1, 1]} : vector<4x8x128xf32> to vector<1x8x128xf32>
    %62 = vector.shape_cast %61 : vector<1x8x128xf32> to vector<8x128xf32>
    %63 = arith.mulf %11, %62 : vector<8x128xf32>
    %c11 = arith.constant 11 : index
    %c0_25 = arith.constant 0 : index
    %c0_26 = arith.constant 0 : index
    %64 = vector.load %arg2[%c11, %c0_25, %c0_26] : memref<15x16x128xf32, #tpu.memory_space<vmem>>, vector<1x8x128xf32>
    %65 = vector.shape_cast %64 : vector<1x8x128xf32> to vector<8x128xf32>
    %66 = vector.shape_cast %63 : vector<8x128xf32> to vector<1x8x128xf32>
    tpu.vector_store %arg2[%c11, %c0_25, %c0_26], %66 {strides = array<i32>} : memref<15x16x128xf32, #tpu.memory_space<vmem>>, vector<1x8x128xf32>,
    %67 = vector.extract_strided_slice %1 {offsets = [2, 0, 0], sizes = [1, 8, 128], strides = [1, 1, 1]} : vector<4x8x128xf32> to vector<1x8x128xf32>
    %68 = vector.shape_cast %67 : vector<1x8x128xf32> to vector<8x128xf32>
    %69 = arith.mulf %16, %68 : vector<8x128xf32>
    %c12 = arith.constant 12 : index
    %c0_27 = arith.constant 0 : index
    %c0_28 = arith.constant 0 : index
    %70 = vector.load %arg2[%c12, %c0_27, %c0_28] : memref<15x16x128xf32, #tpu.memory_space<vmem>>, vector<1x8x128xf32>
    %71 = vector.shape_cast %70 : vector<1x8x128xf32> to vector<8x128xf32>
    %72 = vector.shape_cast %69 : vector<8x128xf32> to vector<1x8x128xf32>
    tpu.vector_store %arg2[%c12, %c0_27, %c0_28], %72 {strides = array<i32>} : memref<15x16x128xf32, #tpu.memory_space<vmem>>, vector<1x8x128xf32>,
    %73 = vector.extract_strided_slice %1 {offsets = [3, 0, 0], sizes = [1, 8, 128], strides = [1, 1, 1]} : vector<4x8x128xf32> to vector<1x8x128xf32>
    %74 = vector.shape_cast %73 : vector<1x8x128xf32> to vector<8x128xf32>
    %75 = arith.mulf %16, %74 : vector<8x128xf32>
    %c13 = arith.constant 13 : index
    %c0_29 = arith.constant 0 : index
    %c0_30 = arith.constant 0 : index
    %76 = vector.load %arg2[%c13, %c0_29, %c0_30] : memref<15x16x128xf32, #tpu.memory_space<vmem>>, vector<1x8x128xf32>
    %77 = vector.shape_cast %76 : vector<1x8x128xf32> to vector<8x128xf32>
    %78 = vector.shape_cast %75 : vector<8x128xf32> to vector<1x8x128xf32>
    tpu.vector_store %arg2[%c13, %c0_29, %c0_30], %78 {strides = array<i32>} : memref<15x16x128xf32, #tpu.memory_space<vmem>>, vector<1x8x128xf32>,
    %79 = vector.extract_strided_slice %1 {offsets = [3, 0, 0], sizes = [1, 8, 128], strides = [1, 1, 1]} : vector<4x8x128xf32> to vector<1x8x128xf32>
    %80 = vector.shape_cast %79 : vector<1x8x128xf32> to vector<8x128xf32>
    %81 = arith.mulf %21, %80 : vector<8x128xf32>
    %c14 = arith.constant 14 : index
    %c0_31 = arith.constant 0 : index
    %c0_32 = arith.constant 0 : index
    %82 = vector.load %arg2[%c14, %c0_31, %c0_32] : memref<15x16x128xf32, #tpu.memory_space<vmem>>, vector<1x8x128xf32>
    %83 = vector.shape_cast %82 : vector<1x8x128xf32> to vector<8x128xf32>
    %84 = vector.shape_cast %81 : vector<8x128xf32> to vector<1x8x128xf32>
    tpu.vector_store %arg2[%c14, %c0_31, %c0_32], %84 {strides = array<i32>} : memref<15x16x128xf32, #tpu.memory_space<vmem>>, vector<1x8x128xf32>,
    %c0_33 = arith.constant 0 : index
    %c8_34 = arith.constant 8 : index
    %c0_35 = arith.constant 0 : index
    %85 = vector.load %arg1[%c0_33, %c8_34, %c0_35] : memref<4x16x128xf32, #tpu.memory_space<vmem>>, vector<4x8x128xf32>
    %c0_36 = arith.constant 0 : index
    %c8_37 = arith.constant 8 : index
    %c0_38 = arith.constant 0 : index
    %86 = vector.load %arg2[%c0_36, %c8_37, %c0_38] : memref<15x16x128xf32, #tpu.memory_space<vmem>>, vector<1x8x128xf32>
    %87 = vector.shape_cast %86 : vector<1x8x128xf32> to vector<8x128xf32>
    %88 = vector.shape_cast %0 : vector<8x128xf32> to vector<1x8x128xf32>
    tpu.vector_store %arg2[%c0_36, %c8_37, %c0_38], %88 {strides = array<i32>} : memref<15x16x128xf32, #tpu.memory_space<vmem>>, vector<1x8x128xf32>,
    %89 = vector.extract_strided_slice %85 {offsets = [0, 0, 0], sizes = [1, 8, 128], strides = [1, 1, 1]} : vector<4x8x128xf32> to vector<1x8x128xf32>
    %90 = vector.shape_cast %89 : vector<1x8x128xf32> to vector<8x128xf32>
    %c1_39 = arith.constant 1 : index
    %c8_40 = arith.constant 8 : index
    %c0_41 = arith.constant 0 : index
    %91 = vector.load %arg2[%c1_39, %c8_40, %c0_41] : memref<15x16x128xf32, #tpu.memory_space<vmem>>, vector<1x8x128xf32>
    %92 = vector.shape_cast %91 : vector<1x8x128xf32> to vector<8x128xf32>
    %93 = vector.shape_cast %90 : vector<8x128xf32> to vector<1x8x128xf32>
    tpu.vector_store %arg2[%c1_39, %c8_40, %c0_41], %93 {strides = array<i32>} : memref<15x16x128xf32, #tpu.memory_space<vmem>>, vector<1x8x128xf32>,
    %94 = vector.extract_strided_slice %85 {offsets = [1, 0, 0], sizes = [1, 8, 128], strides = [1, 1, 1]} : vector<4x8x128xf32> to vector<1x8x128xf32>
    %95 = vector.shape_cast %94 : vector<1x8x128xf32> to vector<8x128xf32>
    %c2_42 = arith.constant 2 : index
    %c8_43 = arith.constant 8 : index
    %c0_44 = arith.constant 0 : index
    %96 = vector.load %arg2[%c2_42, %c8_43, %c0_44] : memref<15x16x128xf32, #tpu.memory_space<vmem>>, vector<1x8x128xf32>
    %97 = vector.shape_cast %96 : vector<1x8x128xf32> to vector<8x128xf32>
    %98 = vector.shape_cast %95 : vector<8x128xf32> to vector<1x8x128xf32>
    tpu.vector_store %arg2[%c2_42, %c8_43, %c0_44], %98 {strides = array<i32>} : memref<15x16x128xf32, #tpu.memory_space<vmem>>, vector<1x8x128xf32>,
    %99 = vector.extract_strided_slice %85 {offsets = [2, 0, 0], sizes = [1, 8, 128], strides = [1, 1, 1]} : vector<4x8x128xf32> to vector<1x8x128xf32>
    %100 = vector.shape_cast %99 : vector<1x8x128xf32> to vector<8x128xf32>
    %c3_45 = arith.constant 3 : index
    %c8_46 = arith.constant 8 : index
    %c0_47 = arith.constant 0 : index
    %101 = vector.load %arg2[%c3_45, %c8_46, %c0_47] : memref<15x16x128xf32, #tpu.memory_space<vmem>>, vector<1x8x128xf32>
    %102 = vector.shape_cast %101 : vector<1x8x128xf32> to vector<8x128xf32>
    %103 = vector.shape_cast %100 : vector<8x128xf32> to vector<1x8x128xf32>
    tpu.vector_store %arg2[%c3_45, %c8_46, %c0_47], %103 {strides = array<i32>} : memref<15x16x128xf32, #tpu.memory_space<vmem>>, vector<1x8x128xf32>,
    %104 = vector.extract_strided_slice %85 {offsets = [3, 0, 0], sizes = [1, 8, 128], strides = [1, 1, 1]} : vector<4x8x128xf32> to vector<1x8x128xf32>
    %105 = vector.shape_cast %104 : vector<1x8x128xf32> to vector<8x128xf32>
    %c4_48 = arith.constant 4 : index
    %c8_49 = arith.constant 8 : index
    %c0_50 = arith.constant 0 : index
    %106 = vector.load %arg2[%c4_48, %c8_49, %c0_50] : memref<15x16x128xf32, #tpu.memory_space<vmem>>, vector<1x8x128xf32>
    %107 = vector.shape_cast %106 : vector<1x8x128xf32> to vector<8x128xf32>
    %108 = vector.shape_cast %105 : vector<8x128xf32> to vector<1x8x128xf32>
    tpu.vector_store %arg2[%c4_48, %c8_49, %c0_50], %108 {strides = array<i32>} : memref<15x16x128xf32, #tpu.memory_space<vmem>>, vector<1x8x128xf32>,
    %109 = vector.extract_strided_slice %85 {offsets = [0, 0, 0], sizes = [1, 8, 128], strides = [1, 1, 1]} : vector<4x8x128xf32> to vector<1x8x128xf32>
    %110 = vector.shape_cast %109 : vector<1x8x128xf32> to vector<8x128xf32>
    %111 = arith.mulf %90, %110 : vector<8x128xf32>
    %c5_51 = arith.constant 5 : index
    %c8_52 = arith.constant 8 : index
    %c0_53 = arith.constant 0 : index
    %112 = vector.load %arg2[%c5_51, %c8_52, %c0_53] : memref<15x16x128xf32, #tpu.memory_space<vmem>>, vector<1x8x128xf32>
    %113 = vector.shape_cast %112 : vector<1x8x128xf32> to vector<8x128xf32>
    %114 = vector.shape_cast %111 : vector<8x128xf32> to vector<1x8x128xf32>
    tpu.vector_store %arg2[%c5_51, %c8_52, %c0_53], %114 {strides = array<i32>} : memref<15x16x128xf32, #tpu.memory_space<vmem>>, vector<1x8x128xf32>,
    %115 = vector.extract_strided_slice %85 {offsets = [1, 0, 0], sizes = [1, 8, 128], strides = [1, 1, 1]} : vector<4x8x128xf32> to vector<1x8x128xf32>
    %116 = vector.shape_cast %115 : vector<1x8x128xf32> to vector<8x128xf32>
    %117 = arith.mulf %90, %116 : vector<8x128xf32>
    %c6_54 = arith.constant 6 : index
    %c8_55 = arith.constant 8 : index
    %c0_56 = arith.constant 0 : index
    %118 = vector.load %arg2[%c6_54, %c8_55, %c0_56] : memref<15x16x128xf32, #tpu.memory_space<vmem>>, vector<1x8x128xf32>
    %119 = vector.shape_cast %118 : vector<1x8x128xf32> to vector<8x128xf32>
    %120 = vector.shape_cast %117 : vector<8x128xf32> to vector<1x8x128xf32>
    tpu.vector_store %arg2[%c6_54, %c8_55, %c0_56], %120 {strides = array<i32>} : memref<15x16x128xf32, #tpu.memory_space<vmem>>, vector<1x8x128xf32>,
    %121 = vector.extract_strided_slice %85 {offsets = [2, 0, 0], sizes = [1, 8, 128], strides = [1, 1, 1]} : vector<4x8x128xf32> to vector<1x8x128xf32>
    %122 = vector.shape_cast %121 : vector<1x8x128xf32> to vector<8x128xf32>
    %123 = arith.mulf %90, %122 : vector<8x128xf32>
    %c7_57 = arith.constant 7 : index
    %c8_58 = arith.constant 8 : index
    %c0_59 = arith.constant 0 : index
    %124 = vector.load %arg2[%c7_57, %c8_58, %c0_59] : memref<15x16x128xf32, #tpu.memory_space<vmem>>, vector<1x8x128xf32>
    %125 = vector.shape_cast %124 : vector<1x8x128xf32> to vector<8x128xf32>
    %126 = vector.shape_cast %123 : vector<8x128xf32> to vector<1x8x128xf32>
    tpu.vector_store %arg2[%c7_57, %c8_58, %c0_59], %126 {strides = array<i32>} : memref<15x16x128xf32, #tpu.memory_space<vmem>>, vector<1x8x128xf32>,
    %127 = vector.extract_strided_slice %85 {offsets = [3, 0, 0], sizes = [1, 8, 128], strides = [1, 1, 1]} : vector<4x8x128xf32> to vector<1x8x128xf32>
    %128 = vector.shape_cast %127 : vector<1x8x128xf32> to vector<8x128xf32>
    %129 = arith.mulf %90, %128 : vector<8x128xf32>
    %c8_60 = arith.constant 8 : index
    %c8_61 = arith.constant 8 : index
    %c0_62 = arith.constant 0 : index
    %130 = vector.load %arg2[%c8_60, %c8_61, %c0_62] : memref<15x16x128xf32, #tpu.memory_space<vmem>>, vector<1x8x128xf32>
    %131 = vector.shape_cast %130 : vector<1x8x128xf32> to vector<8x128xf32>
    %132 = vector.shape_cast %129 : vector<8x128xf32> to vector<1x8x128xf32>
    tpu.vector_store %arg2[%c8_60, %c8_61, %c0_62], %132 {strides = array<i32>} : memref<15x16x128xf32, #tpu.memory_space<vmem>>, vector<1x8x128xf32>,
    %133 = vector.extract_strided_slice %85 {offsets = [1, 0, 0], sizes = [1, 8, 128], strides = [1, 1, 1]} : vector<4x8x128xf32> to vector<1x8x128xf32>
    %134 = vector.shape_cast %133 : vector<1x8x128xf32> to vector<8x128xf32>
    %135 = arith.mulf %95, %134 : vector<8x128xf32>
    %c9_63 = arith.constant 9 : index
    %c8_64 = arith.constant 8 : index
    %c0_65 = arith.constant 0 : index
    %136 = vector.load %arg2[%c9_63, %c8_64, %c0_65] : memref<15x16x128xf32, #tpu.memory_space<vmem>>, vector<1x8x128xf32>
    %137 = vector.shape_cast %136 : vector<1x8x128xf32> to vector<8x128xf32>
    %138 = vector.shape_cast %135 : vector<8x128xf32> to vector<1x8x128xf32>
    tpu.vector_store %arg2[%c9_63, %c8_64, %c0_65], %138 {strides = array<i32>} : memref<15x16x128xf32, #tpu.memory_space<vmem>>, vector<1x8x128xf32>,
    %139 = vector.extract_strided_slice %85 {offsets = [2, 0, 0], sizes = [1, 8, 128], strides = [1, 1, 1]} : vector<4x8x128xf32> to vector<1x8x128xf32>
    %140 = vector.shape_cast %139 : vector<1x8x128xf32> to vector<8x128xf32>
    %141 = arith.mulf %95, %140 : vector<8x128xf32>
    %c10_66 = arith.constant 10 : index
    %c8_67 = arith.constant 8 : index
    %c0_68 = arith.constant 0 : index
    %142 = vector.load %arg2[%c10_66, %c8_67, %c0_68] : memref<15x16x128xf32, #tpu.memory_space<vmem>>, vector<1x8x128xf32>
    %143 = vector.shape_cast %142 : vector<1x8x128xf32> to vector<8x128xf32>
    %144 = vector.shape_cast %141 : vector<8x128xf32> to vector<1x8x128xf32>
    tpu.vector_store %arg2[%c10_66, %c8_67, %c0_68], %144 {strides = array<i32>} : memref<15x16x128xf32, #tpu.memory_space<vmem>>, vector<1x8x128xf32>,
    %145 = vector.extract_strided_slice %85 {offsets = [3, 0, 0], sizes = [1, 8, 128], strides = [1, 1, 1]} : vector<4x8x128xf32> to vector<1x8x128xf32>
    %146 = vector.shape_cast %145 : vector<1x8x128xf32> to vector<8x128xf32>
    %147 = arith.mulf %95, %146 : vector<8x128xf32>
    %c11_69 = arith.constant 11 : index
    %c8_70 = arith.constant 8 : index
    %c0_71 = arith.constant 0 : index
    %148 = vector.load %arg2[%c11_69, %c8_70, %c0_71] : memref<15x16x128xf32, #tpu.memory_space<vmem>>, vector<1x8x128xf32>
    %149 = vector.shape_cast %148 : vector<1x8x128xf32> to vector<8x128xf32>
    %150 = vector.shape_cast %147 : vector<8x128xf32> to vector<1x8x128xf32>
    tpu.vector_store %arg2[%c11_69, %c8_70, %c0_71], %150 {strides = array<i32>} : memref<15x16x128xf32, #tpu.memory_space<vmem>>, vector<1x8x128xf32>,
    %151 = vector.extract_strided_slice %85 {offsets = [2, 0, 0], sizes = [1, 8, 128], strides = [1, 1, 1]} : vector<4x8x128xf32> to vector<1x8x128xf32>
    %152 = vector.shape_cast %151 : vector<1x8x128xf32> to vector<8x128xf32>
    %153 = arith.mulf %100, %152 : vector<8x128xf32>
    %c12_72 = arith.constant 12 : index
    %c8_73 = arith.constant 8 : index
    %c0_74 = arith.constant 0 : index
    %154 = vector.load %arg2[%c12_72, %c8_73, %c0_74] : memref<15x16x128xf32, #tpu.memory_space<vmem>>, vector<1x8x128xf32>
    %155 = vector.shape_cast %154 : vector<1x8x128xf32> to vector<8x128xf32>
    %156 = vector.shape_cast %153 : vector<8x128xf32> to vector<1x8x128xf32>
    tpu.vector_store %arg2[%c12_72, %c8_73, %c0_74], %156 {strides = array<i32>} : memref<15x16x128xf32, #tpu.memory_space<vmem>>, vector<1x8x128xf32>,
    %157 = vector.extract_strided_slice %85 {offsets = [3, 0, 0], sizes = [1, 8, 128], strides = [1, 1, 1]} : vector<4x8x128xf32> to vector<1x8x128xf32>
    %158 = vector.shape_cast %157 : vector<1x8x128xf32> to vector<8x128xf32>
    %159 = arith.mulf %100, %158 : vector<8x128xf32>
    %c13_75 = arith.constant 13 : index
    %c8_76 = arith.constant 8 : index
    %c0_77 = arith.constant 0 : index
    %160 = vector.load %arg2[%c13_75, %c8_76, %c0_77] : memref<15x16x128xf32, #tpu.memory_space<vmem>>, vector<1x8x128xf32>
    %161 = vector.shape_cast %160 : vector<1x8x128xf32> to vector<8x128xf32>
    %162 = vector.shape_cast %159 : vector<8x128xf32> to vector<1x8x128xf32>
    tpu.vector_store %arg2[%c13_75, %c8_76, %c0_77], %162 {strides = array<i32>} : memref<15x16x128xf32, #tpu.memory_space<vmem>>, vector<1x8x128xf32>,
    %163 = vector.extract_strided_slice %85 {offsets = [3, 0, 0], sizes = [1, 8, 128], strides = [1, 1, 1]} : vector<4x8x128xf32> to vector<1x8x128xf32>
    %164 = vector.shape_cast %163 : vector<1x8x128xf32> to vector<8x128xf32>
    %165 = arith.mulf %105, %164 : vector<8x128xf32>
    %c14_78 = arith.constant 14 : index
    %c8_79 = arith.constant 8 : index
    %c0_80 = arith.constant 0 : index
    %166 = vector.load %arg2[%c14_78, %c8_79, %c0_80] : memref<15x16x128xf32, #tpu.memory_space<vmem>>, vector<1x8x128xf32>
    %167 = vector.shape_cast %166 : vector<1x8x128xf32> to vector<8x128xf32>
    %168 = vector.shape_cast %165 : vector<8x128xf32> to vector<1x8x128xf32>
    tpu.vector_store %arg2[%c14_78, %c8_79, %c0_80], %168 {strides = array<i32>} : memref<15x16x128xf32, #tpu.memory_space<vmem>>, vector<1x8x128xf32>,
    return
  }
  func.func @transform_0(%arg0: i32) -> (i32, i32, i32) {
    %c0_i32 = arith.constant 0 : i32
    %c0_i32_0 = arith.constant 0 : i32
    %c0_i32_1 = arith.constant 0 : i32
    return %c0_i32, %arg0, %c0_i32_0 : i32, i32, i32
  }
  func.func @transform_1(%arg0: i32) -> (i32, i32, i32) {
    %c0_i32 = arith.constant 0 : i32
    %c0_i32_0 = arith.constant 0 : i32
    %c0_i32_1 = arith.constant 0 : i32
    return %c0_i32, %arg0, %c0_i32_0 : i32, i32, i32
  }
}

</mosaic_0001>

<bundles_post_ra>
// kernel: tpu_custom_call.1
= control target key start
LH: loop header
LB: loop body
LE: loop exit
PB: predicated region body
PF: predicated region fallthrough
CT: control target
= control target key end

     0   :  { %6 = vsyncpa [#allocation3], 0  ;;  %s697_s0 = inlined_call_operand.hbm [shape: f32[4,32,128], index: 0, kind: input, shape index: {}]   ;;  %s698_s1 = inlined_call_operand.hbm [shape: f32[15,32,128], index: 1, kind: output, shape index: {}]  }
   0x1   :  { %8 = vsyncpa [#allocation3 + $0x1], 0 }
   0x2   :  { %9 = vsyncpa [#allocation4], 0 }
   0x3   :  { %11 = vsyncpa [#allocation4 + $0x1], 0  ;;  %s525_s6 = smov 0   ;;  %s527_s7 = smov 0  }
   0x4   :  { %s529_s8 = smov 0   ;;  %s531_s9 = smov 0  }
   0x5 LB: > { %s546_s10 = sadd.s32 4294967295, %s499_s9   ;;  %s348_s11 = sadd.s32 4294967294, %s499_s9   ;;  %s499_s9 = sphi %s531_s9, %s706_s9   ;;  %s495_s8 = sphi %s529_s8, %s705_s8   ;;  %s491_s7 = sphi %s527_s7, %s704_s7   ;;  %s487_s6 = sphi %s525_s6, %s703_s6  }
   0x6   : > { %s550_s12 = sadd.s32 1, %s499_s9   ;;  %s24_s13 = sadd.s32 1, %s495_s8 }
   0x7   : > { %s21_s14 = ssub.s32 %s499_s9, %s550_s12  ;;  %p31_p0 = scmp.ne.s32.totalorder %s495_s8, %s491_s7 }
   0x8   : > { %p22_p1 = scmp.eq.s32.totalorder %s21_s14, 0  ;;  %p32_p2 = scmp.eq.s32.totalorder %s499_s9, 0 }
   0x9   : > { %p37_p3 = scmp.ne.s32.totalorder %s491_s7, %s487_s6  ;;  %p38_p4 = scmp.eq.s32.totalorder %s546_s10, 0 }
   0xa   : > { %s562_s15 = scalar_select %p22_p1, %s495_s8, %s24_s13  }
   0xb   : > { %p564_p5 = por %p32_p2, %p31_p0  ;;  %p568_p6 = por %p38_p4, %p37_p3 }
   0xc   : > { %p61_p7 = scmp.eq.s32.totalorder %s546_s10, 1  ;;  %p67_p8 = scmp.eq.s32.totalorder %s348_s11, 1 }
   0xd   : > { %p350_p11 = scmp.ge.s32.totalorder %s499_s9, 2 }
   0xe   : > { %p573_p9 = por %p61_p7, %p31_p0  ;;  %p577_p10 = por %p67_p8, %p37_p3 }
   0xf   : > { %83 = sbr.rel (%p350_p11) target bundleno = 34 (0x22), region = 16 }
  0x14   : > { %s87_s20 = sand.u32 1, %s495_s8   ;;  %s390_s21 = sshll.u32 %s499_s9, 4 }
  0x15   : > { %s351_s22 = sshll.u32 %s87_s20, 6  ;;  %s96_s25 = scalar_lea.hbm %s697_s0, %s390_s21 }
  0x16   : > { %s393_s26 = scalar_select %p564_p5, [#allocation0], [#allocation10] }
  0x17   : > { %s109_s27 = sshll.u32 %s96_s25, 4  ;;  %s91_s28 = scalar_lea.vmem [#allocation2], %s351_s22  ;;  %s110_s27 = int_to_ptr.hbm [resolvable:$true] %s109_s27 }
  0x18   : > { %s111_s29 = sshll.u32 %s91_s28, 4  ;;  %s101_s30 = sld [smem:[%s393_s26]]   ;;  %s112_s29 = int_to_ptr.vmem [resolvable:$true] %s111_s29 }
  0x19   : > { %s501_s2 = smov 512   ;;  %s502_s3 = smov 256  }
  0x1a   : > { %394 = sst [smem:[#allocation7]] (%p564_p5), %s501_s2  ;;  %s503_s4 = smov 2  }
  0x1b   : > { %395 = sst [smem:[#allocation7 + $0x1]] (%p564_p5), %s502_s3  ;;  %s504_s5 = smov 128  }
  0x1c   : > { %396 = sst [smem:[#allocation7 + $0x2]] (%p564_p5), %s503_s4  ;;  %s505_s14 = smov 8  }
  0x1d   : > { %397 = sst [smem:[#allocation7 + $0x3]] (%p564_p5), %s504_s5  ;;  %s88_s21 = scalar_lea.sflag [#allocation3], %s87_s20 }
  0x1e   : > { %s354_s11 = sshll.u32 %s101_s30, 26  ;;  %398 = sst [smem:[#allocation7 + $0x4]] (%p564_p5), %s504_s5 }
  0x1f   : > { %s355_s13 = sadd.s32 134217728, %s354_s11  ;;  %399 = sst [smem:[#allocation7 + $0x5]] (%p564_p5), %s505_s14 }
  0x20   : > { %s506_s22 = smov [#allocation6]  }
  0x21   : > { %400 = dma.general (%p564_p5), %s110_s27, 1024, %s112_s29, %s88_s21, %s506_s22, [#allocation7], %s355_s13, 0  }
  0x22 PF: > { %p356_p12 = scmp.ge.s32.totalorder %s499_s9, 1  ;;  %p132_p13 = scmp.lt.s32.totalorder %s499_s9, 3 }
  0x24   : > { %p133_p0 = pnand %p356_p12, %p132_p13 }
  0x25   : > { %s608_s23 = sand.u32 (!%p133_p0), 1, %s491_s7  }
  0x26   : > { %136 = sbr.rel (%p133_p0) target bundleno = 87 (0x57), region = 24  ;;  %s357_s24 = sshll.u32 (!%p133_p0), %s608_s23, 6 }
  0x27   : > { %s139_s25 = scalar_lea.sflag (!%p133_p0), [#allocation3], %s608_s23  ;;  %s612_s26 = scalar_lea.vmem (!%p133_p0), [#allocation2], %s357_s24 }
  0x2b   : > { %478 = dma.done.wait (%p568_p6), %s139_s25, 1024  }
  0x2c   : > { %480 = vsyncadd (%p568_p6), %s139_s25, 4294966272  ;;  %s392_s16 = smul.u32 240, %s608_s23  ;;  %v507_v0 = vmov 1.0   ;;  %v164_v1 = vld [vmem:[%s612_s26] sm:$0xff]  ;;  %v165_v2 = vld [vmem:[%s612_s26 + $0x10] sm:$0xff]  ;;  %s237_s17 = scalar_lea.sflag [#allocation4], %s608_s23 }
  0x2d   : > { %v166_v3 = vld [vmem:[%s612_s26 + $0x20] sm:$0xff]  ;;  %v167_v4 = vld [vmem:[%s612_s26 + $0x30] sm:$0xff]  ;;  %v177_v5 = vmul.f32 %v164_v1, %v164_v1  ;;  %v180_v6 = vmul.f32 %v165_v2, %v164_v1  ;;  %v189_v9 = vmul.f32 %v165_v2, %v165_v2  ;;  %v207_v15 = vld [vmem:[%s612_s26 + $0x8] sm:$0xff] }
  0x2e   : > { %s619_s20 = scalar_lea.vmem [#allocation5], %s392_s16  ;;  %v183_v7 = vmul.f32 %v166_v3, %v164_v1  ;;  %v186_v8 = vmul.f32 %v167_v4, %v164_v1  ;;  %v192_v10 = vmul.f32 %v166_v3, %v165_v2  ;;  %v195_v11 = vmul.f32 %v167_v4, %v165_v2  ;;  %v208_v16 = vld [vmem:[%s612_s26 + $0x18] sm:$0xff]  ;;  %v209_v17 = vld [vmem:[%s612_s26 + $0x28] sm:$0xff] }
  0x2f   : > { %168 = vst [vmem:[%s619_s20] sm:$0xff] %v507_v0  ;;  %v198_v12 = vmul.f32 %v166_v3, %v166_v3  ;;  %v201_v13 = vmul.f32 %v167_v4, %v166_v3  ;;  %v204_v14 = vmul.f32 %v167_v4, %v167_v4  ;;  %v210_v18 = vld [vmem:[%s612_s26 + $0x38] sm:$0xff]  ;;  %v216_v19 = vmul.f32 %v207_v15, %v207_v15 }
  0x30   : > { %211 = vst [vmem:[%s619_s20 + $0x8] sm:$0xff] %v507_v0  ;;  %v218_v20 = vmul.f32 %v208_v16, %v207_v15  ;;  %v220_v21 = vmul.f32 %v209_v17, %v207_v15  ;;  %v222_v22 = vmul.f32 %v210_v18, %v207_v15  ;;  %v224_v23 = vmul.f32 %v208_v16, %v208_v16 }
  0x31   : > { %358 = vst [vmem:[%s619_s20 + $0x10] sm:$0xff] %v164_v1  ;;  %v226_v24 = vmul.f32 %v209_v17, %v208_v16  ;;  %v228_v25 = vmul.f32 %v210_v18, %v208_v16  ;;  %v230_v26 = vmul.f32 %v209_v17, %v209_v17  ;;  %v232_v27 = vmul.f32 %v210_v18, %v209_v17 }
  0x32   : > { %359 = vst [vmem:[%s619_s20 + $0x20] sm:$0xff] %v165_v2  ;;  %v234_v28 = vmul.f32 %v210_v18, %v210_v18 }
  0x33   : > { %360 = vst [vmem:[%s619_s20 + $0x30] sm:$0xff] %v166_v3 }
  0x34   : > { %361 = vst [vmem:[%s619_s20 + $0x40] sm:$0xff] %v167_v4 }
  0x35   : > { %362 = vst [vmem:[%s619_s20 + $0x50] sm:$0xff] %v177_v5 }
  0x36   : > { %363 = vst [vmem:[%s619_s20 + $0x60] sm:$0xff] %v180_v6 }
  0x37   : > { %364 = vst [vmem:[%s619_s20 + $0x70] sm:$0xff] %v183_v7 }
  0x38   : > { %365 = vst [vmem:[%s619_s20 + $0x80] sm:$0xff] %v186_v8 }
  0x39   : > { %366 = vst [vmem:[%s619_s20 + $0x90] sm:$0xff] %v189_v9 }
  0x3a   : > { %367 = vst [vmem:[%s619_s20 + $0xa0] sm:$0xff] %v192_v10 }
  0x3b   : > { %368 = vst [vmem:[%s619_s20 + $0xb0] sm:$0xff] %v195_v11 }
  0x3c   : > { %369 = vst [vmem:[%s619_s20 + $0xc0] sm:$0xff] %v198_v12 }
  0x3d   : > { %370 = vst [vmem:[%s619_s20 + $0xd0] sm:$0xff] %v201_v13 }
  0x3e   : > { %371 = vst [vmem:[%s619_s20 + $0xe0] sm:$0xff] %v204_v14 }
  0x3f   : > { %372 = vst [vmem:[%s619_s20 + $0x18] sm:$0xff] %v207_v15 }
  0x40   : > { %373 = vst [vmem:[%s619_s20 + $0x28] sm:$0xff] %v208_v16 }
  0x41   : > { %374 = vst [vmem:[%s619_s20 + $0x38] sm:$0xff] %v209_v17 }
  0x42   : > { %375 = vst [vmem:[%s619_s20 + $0x48] sm:$0xff] %v210_v18 }
  0x43   : > { %376 = vst [vmem:[%s619_s20 + $0x58] sm:$0xff] %v216_v19 }
  0x44   : > { %377 = vst [vmem:[%s619_s20 + $0x68] sm:$0xff] %v218_v20 }
  0x45   : > { %378 = vst [vmem:[%s619_s20 + $0x78] sm:$0xff] %v220_v21 }
  0x46   : > { %379 = vst [vmem:[%s619_s20 + $0x88] sm:$0xff] %v222_v22 }
  0x47   : > { %380 = vst [vmem:[%s619_s20 + $0x98] sm:$0xff] %v224_v23 }
  0x48   : > { %381 = vst [vmem:[%s619_s20 + $0xa8] sm:$0xff] %v226_v24 }
  0x49   : > { %382 = vst [vmem:[%s619_s20 + $0xb8] sm:$0xff] %v228_v25 }
  0x4a   : > { %383 = vst [vmem:[%s619_s20 + $0xc8] sm:$0xff] %v230_v26 }
  0x4b   : > { %384 = vst [vmem:[%s619_s20 + $0xd8] sm:$0xff] %v232_v27 }
  0x4c   : > { %385 = vst [vmem:[%s619_s20 + $0xe8] sm:$0xff] %v234_v28 }
  0x4d   : > { %s391_s27 = sshll.u32 %s546_s10, 4  ;;  %s259_s28 = sshll.u32 %s619_s20, 4  ;;  %s260_s28 = int_to_ptr.vmem [resolvable:$true] %s259_s28 }
  0x4e   : > { %s248_s2 = scalar_lea.hbm %s698_s1, %s391_s27  ;;  %s508_s4 = smov 256  }
  0x4f   : > { %s261_s3 = sshll.u32 %s248_s2, 4  ;;  %402 = sst [smem:[#allocation9]] (%p573_p9), %s508_s4  ;;  %s262_s3 = int_to_ptr.hbm [resolvable:$true] %s261_s3 }
  0x50   : > { %s509_s5 = smov 512   ;;  %s510_s11 = smov 2  }
  0x51   : > { %403 = sst [smem:[#allocation9 + $0x1]] (%p573_p9), %s509_s5  ;;  %s511_s10 = smov 128  }
  0x52   : > { %404 = sst [smem:[#allocation9 + $0x2]] (%p573_p9), %s510_s11  ;;  %s512_s13 = smov 8  }
  0x53   : > { %405 = sst [smem:[#allocation9 + $0x3]] (%p573_p9), %s511_s10  ;;  %s513_s14 = smov [#allocation8]  }
  0x54   : > { %406 = sst [smem:[#allocation9 + $0x4]] (%p573_p9), %s511_s10  ;;  %s514_s21 = smov 0  }
  0x55   : > { %407 = sst [smem:[#allocation9 + $0x5]] (%p573_p9), %s512_s13 }
  0x56   : > { %408 = dma.general (%p573_p9), %s260_s28, 3840, %s262_s3, %s237_s17, %s513_s14, [#allocation9], %s514_s21, 0  }
  0x57 PF: > { %s289_s22 = sand.u32 1, %s487_s6   ;;  %p411_p1 = pnand %p350_p11, %p577_p10 }
  0x58   : > { %s290_s23 = scalar_lea.sflag [#allocation4], %s289_s22 }
  0x59   : > { %p412_p2 = pneg %p411_p1 }
  0x5b   : > { %482 = dma.done.wait (%p412_p2), %s290_s23, 3840  }
  0x5c   : > { %484 = vsyncadd (%p412_p2), %s290_s23, 4294963456  ;;  %p14_p3 = scmp.ge.s32.totalorder %s550_s12, 4   ;;  %s703_s6 = smov %s491_s7 }
  0x5d   : > { %s704_s7 = smov %s495_s8  ;;  %s705_s8 = smov %s562_s15 }
  0x5e   : > { %s706_s9 = smov %s550_s12  ;;  %16 = sbr.rel (!%p14_p3) target bundleno = 5 (0x5), region = 93 }
  0x63   :  { %296 = vsyncpa [#allocation3], 1 }
  0x64   :  { %298 = vsyncpa [#allocation3 + $0x1], 1 }
  0x65   :  { %299 = vsyncpa [#allocation4], 1 }
  0x66   :  { %301 = vsyncpa [#allocation4 + $0x1], 1 }

</bundles_post_ra>
